<compile_context>
chip_gen: v7x
topology: tpu7x:2x2x1
jax: 0.10.0
libtpu: 0.0.40
codegen_flags: <defaults>
</compile_context>

<pallas_src>
import functools

import jax
import jax.numpy as jnp
from jax.experimental import pallas as pl
from jax.experimental.pallas import tpu as pltpu

DELTA = 1e-6


def _controller_kernel(x_ref, wf_ref, bf_ref, mkT_ref, mknorm_ref, o_ref,
                       *, pkey_dim, P, W):
    x = x_ref[...]                                                   # (TB, D)

    # One fused MXU matmul against [Wk^T | Ws^T | MPr]  (D == H).
    y = jnp.dot(x, wf_ref[...], preferred_element_type=jnp.float32)  # (TB, pkey+1+P*W)

    ks = y[:, :pkey_dim + 1] + bf_ref[...]                           # (TB, pkey+1)
    keys = jnp.tanh(ks[:, :pkey_dim])                                # (TB, pkey)
    strength = jax.nn.softplus(ks[:, pkey_dim:pkey_dim + 1])         # (TB, 1)
    G = y[:, pkey_dim + 1:]                                          # (TB, P*W) = [x @ MP_p]_p

    # θ (batchwise "cosine" distance, reproducing the original normalization).
    # mk_norm is a precomputed (1, P) row -> denominator is a VPU broadcast mul.
    k_norm = jnp.sqrt(jnp.sum(keys * keys, axis=1, keepdims=True)) + DELTA   # (TB, 1)
    # NOTE: `num` stays on the MXU.  With pkey=10 / P=2 it is a tiny push; the
    # VPU-multiply + XLU lane-reduce alternative (v5e/v6e MRF-latency argument)
    # is only worth taking after a bundle dump confirms the serial drain.
    num = jnp.dot(keys, mkT_ref[...], preferred_element_type=jnp.float32)    # (TB, P)
    den = pkey_dim * (k_norm * mknorm_ref[...]) + DELTA                      # (TB, P)
    d = num / den                                    # exact divide: den can be ~1e-5

    # content weights (softmax over programs), scaled by strength.
    logits = d * strength                                                    # (TB, P)
    m = jnp.max(logits, axis=-1, keepdims=True)
    e = jnp.exp(logits - m)
    cw = e / jnp.sum(e, axis=-1, keepdims=True)      # exact divide on a (TB,1) denom

    # linear_read + final contraction, reassociated:
    #   o[b] = x[b] @ (sum_p cw[b,p] * MP_p)  ==  sum_p cw[b,p] * (x[b] @ MP_p)
    TB = x.shape[0]
    o = jnp.zeros((TB, W), jnp.float32)
    for p in range(P):                               # P is small & static (P=2)
        o = o + cw[:, p:p + 1] * G[:, p * W:(p + 1) * W]
    o_ref[...] = o

    # TODO(synk): `program_scales` in read_program is computed but never used /
    # returned by forward(), so it is intentionally not reproduced here.


def prepare_controller_params(mprogram_weights, wk, bk, ws, bs,
                              *, pkey_dim, program_shape):
    """One-time (per weight update) layout prep — hoisted out of the per-call path."""
    H, W = program_shape
    P = mprogram_weights.shape[0]
    MK = jnp.tanh(mprogram_weights[:, :pkey_dim])                        # (P, pkey)
    mkT = MK.T                                                           # (pkey, P)
    mk_norm = (jnp.sqrt(jnp.sum(MK * MK, axis=1)) + DELTA).reshape(1, P) # (1, P)
    MP = mprogram_weights[:, pkey_dim:pkey_dim + H * W]                  # (P, H*W)
    MPr = MP.reshape(P, H, W).transpose(1, 0, 2).reshape(H, P * W)       # (H, P*W)
    wf = jnp.concatenate([wk.T, ws.T, MPr], axis=1)                      # (D, pkey+1+P*W)
    bf = jnp.concatenate([bk, bs]).reshape(1, pkey_dim + 1)              # (1, pkey+1)
    return wf, bf, mkT, mk_norm


def programmed_controller_forward(x, wf, bf, mkT, mk_norm,
                                  *, pkey_dim, P, W, block_b=128):
    """x: (B, D) with D == program_shape[0]. Returns (B, W)."""
    B, D = x.shape
    kernel = functools.partial(_controller_kernel, pkey_dim=pkey_dim, P=P, W=W)
    out_shape = jax.ShapeDtypeStruct((B, W), jnp.float32)

    if B > block_b and B % block_b == 0:
        # Batched path: grid over batch rows; ~3 KB of weights stay VMEM-resident
        # via constant index_maps; batch axis is "parallel" (v7x 2nd TC).
        const = lambda arr: pl.BlockSpec(arr.shape, lambda i: (0, 0))
        return pl.pallas_call(
            kernel,
            out_shape=out_shape,
            grid=(B // block_b,),
            in_specs=[
                pl.BlockSpec((block_b, D), lambda i: (i, 0)),
                const(wf), const(bf), const(mkT), const(mk_norm),
            ],
            out_specs=pl.BlockSpec((block_b, W), lambda i: (i, 0)),
            compiler_params=pltpu.CompilerParams(
                dimension_semantics=("parallel",)),
        )(x, wf, bf, mkT, mk_norm)

    # Tiny-batch path: total live data is a few KB — whole arrays in VMEM, no grid.
    vmem = pl.BlockSpec(memory_space=pltpu.MemorySpace.VMEM)
    return pl.pallas_call(
        kernel,
        out_shape=out_shape,
        in_specs=[vmem] * 5,
        out_specs=vmem,
    )(x, wf, bf, mkT, mk_norm)


def _xavier_uniform(key, shape, gain=1.4):
    fan_out, fan_in = shape
    bound = gain * (6.0 / (fan_in + fan_out)) ** 0.5
    return jax.random.uniform(key, shape, jnp.float32, -bound, bound)


def _reference(x, mprogram_weights, wk, bk, ws, bs, *, pkey_dim, program_shape):
    H, W = program_shape
    MK = jnp.tanh(mprogram_weights[:, :pkey_dim])
    MP = mprogram_weights[:, pkey_dim:pkey_dim + H * W]
    keys = jnp.tanh(x @ wk.T + bk)
    strength = jax.nn.softplus(x @ ws.T + bs)
    mk_norm = jnp.linalg.norm(MK, axis=1, keepdims=True) + DELTA
    k_norm = jnp.linalg.norm(keys, axis=1, keepdims=True) + DELTA
    num = keys @ MK.T
    den = pkey_dim * (k_norm @ mk_norm.T) + DELTA
    cw = jax.nn.softmax((num / den) * strength, axis=-1)
    ww = (cw @ MP).reshape(x.shape[0], H, W)
    return jnp.einsum('bh,bhw->bw', x, ww)


if __name__ == "__main__":
    # Small shapes consistent with the module: interface size == program_shape[0].
    program_shape = (16, 16)          # (H, W)
    H, W = program_shape
    interface_size = H
    pkey_dim = 10
    num_program = 2

    root = jax.random.PRNGKey(0)
    k_mp, k_wk, k_bk, k_ws, k_bs, k_x, k_xb = jax.random.split(root, 7)

    # Deterministic parameter init (matches initialize(): xavier(gain=1.4) + N(0, 0.01) biases).
    mprogram_weights = _xavier_uniform(k_mp, (num_program, pkey_dim + H * W))
    wk = _xavier_uniform(k_wk, (pkey_dim, interface_size))
    bk = 0.01 * jax.random.normal(k_bk, (pkey_dim,), jnp.float32)
    ws = _xavier_uniform(k_ws, (1, interface_size))
    bs = 0.01 * jax.random.normal(k_bs, (1,), jnp.float32)

    # One-time parameter layout prep (hoisted out of the per-call hot path).
    wf, bf, mkT, mk_norm = prepare_controller_params(
        mprogram_weights, wk, bk, ws, bs,
        pkey_dim=pkey_dim, program_shape=program_shape)

    fwd = jax.jit(functools.partial(
        programmed_controller_forward, pkey_dim=pkey_dim, P=num_program, W=W))

    # 1) Tiny-batch path (B=2): whole-array VMEM, no grid.
    x_small = jax.random.normal(k_x, (2, interface_size), jnp.float32)
    out_small = jax.block_until_ready(fwd(x_small, wf, bf, mkT, mk_norm))
    ref_small = _reference(x_small, mprogram_weights, wk, bk, ws, bs,
                           pkey_dim=pkey_dim, program_shape=program_shape)
    assert out_small.shape == (2, W)
    assert jnp.max(jnp.abs(out_small - ref_small)) < 1e-3

    # 2) Batched path (B=512): batch grid, resident weights, parallel axis.
    x_big = jax.random.normal(k_xb, (512, interface_size), jnp.float32)
    out_big = jax.block_until_ready(fwd(x_big, wf, bf, mkT, mk_norm))
    ref_big = _reference(x_big, mprogram_weights, wk, bk, ws, bs,
                         pkey_dim=pkey_dim, program_shape=program_shape)
    assert out_big.shape == (512, W)
    assert jnp.max(jnp.abs(out_big - ref_big)) < 1e-3

    print("KERNEL_OK")
</pallas_src>

<mosaic_0001>
module attributes {stable_mosaic.version = 11 : i64} {
  func.func @_controller_kernel(%arg0: memref<2x16xf32, #tpu.memory_space<vmem>>, %arg1: memref<16x43xf32, #tpu.memory_space<vmem>>, %arg2: memref<1x11xf32, #tpu.memory_space<vmem>>, %arg3: memref<10x2xf32, #tpu.memory_space<vmem>>, %arg4: memref<1x2xf32, #tpu.memory_space<vmem>>, %arg5: memref<2x16xf32, #tpu.memory_space<vmem>>) attributes {dimension_semantics = [], scalar_prefetch = 0 : i64, scratch_operands = 0 : i64, tpu.core_type = #tpu.core_type<tc>} {
    %c0 = arith.constant 0 : index
    %c0_0 = arith.constant 0 : index
    %0 = vector.load %arg0[%c0, %c0_0] : memref<2x16xf32, #tpu.memory_space<vmem>>, vector<2x16xf32>
    %c0_1 = arith.constant 0 : index
    %c0_2 = arith.constant 0 : index
    %1 = vector.load %arg1[%c0_1, %c0_2] : memref<16x43xf32, #tpu.memory_space<vmem>>, vector<16x43xf32>
    %cst = arith.constant dense<0.000000e+00> : vector<2x43xf32>
    %2 = tpu.matmul %0, %1, %cst {dimension_numbers = #tpu.dot_dimension_numbers<[1], [0], [0], [1], [0, 0, 1, 1], [], []>} : vector<2x16xf32>, vector<16x43xf32>, vector<2x43xf32> -> vector<2x43xf32>
    %3 = vector.extract_strided_slice %2 {offsets = [0, 0], sizes = [2, 11], strides = [1, 1]} : vector<2x43xf32> to vector<2x11xf32>
    %c0_3 = arith.constant 0 : index
    %c0_4 = arith.constant 0 : index
    %4 = vector.load %arg2[%c0_3, %c0_4] : memref<1x11xf32, #tpu.memory_space<vmem>>, vector<1x11xf32>
    %5 = vector.broadcast %4 : vector<1x11xf32> to vector<2x11xf32>
    %6 = arith.addf %3, %5 : vector<2x11xf32>
    %7 = vector.extract_strided_slice %6 {offsets = [0, 0], sizes = [2, 10], strides = [1, 1]} : vector<2x11xf32> to vector<2x10xf32>
    %8 = math.tanh %7 : vector<2x10xf32>
    %9 = vector.extract_strided_slice %6 {offsets = [0, 10], sizes = [2, 1], strides = [1, 1]} : vector<2x11xf32> to vector<2x1xf32>
    %cst_5 = arith.constant 0.000000e+00 : f32
    %10 = vector.broadcast %cst_5 : f32 to vector<2x1xf32>
    %11 = arith.maximumf %9, %10 : vector<2x1xf32>
    %12 = vector.broadcast %cst_5 : f32 to vector<2x1xf32>
    %13 = arith.subf %9, %12 : vector<2x1xf32>
    %14 = arith.cmpf one, %13, %13 : vector<2x1xf32>
    %15 = vector.broadcast %cst_5 : f32 to vector<2x1xf32>
    %16 = arith.addf %9, %15 : vector<2x1xf32>
    %17 = math.absf %13 : vector<2x1xf32>
    %cst_6 = arith.constant 0.000000e+00 : f32
    %18 = vector.broadcast %cst_6 : f32 to vector<2x1xf32>
    %19 = arith.subf %18, %17 : vector<2x1xf32>
    %20 = math.exp %19 : vector<2x1xf32>
    %21 = math.log1p %20 : vector<2x1xf32>
    %22 = arith.addf %11, %21 : vector<2x1xf32>
    %23 = arith.select %14, %16, %22 : vector<2x1xi1>, vector<2x1xf32>
    %24 = vector.extract_strided_slice %2 {offsets = [0, 11], sizes = [2, 32], strides = [1, 1]} : vector<2x43xf32> to vector<2x32xf32>
    %25 = arith.mulf %8, %8 : vector<2x10xf32>
    %cst_7 = arith.constant dense<0.000000e+00> : vector<2xf32>
    %26 = vector.multi_reduction <add>, %25, %cst_7 [1] : vector<2x10xf32> to vector<2xf32>
    %27 = vector.shape_cast %26 : vector<2xf32> to vector<2x1xf32>
    %28 = math.sqrt %27 : vector<2x1xf32>
    %cst_8 = arith.constant 9.99999997E-7 : f32
    %29 = vector.broadcast %cst_8 : f32 to vector<2x1xf32>
    %30 = arith.addf %28, %29 : vector<2x1xf32>
    %c0_9 = arith.constant 0 : index
    %c0_10 = arith.constant 0 : index
    %31 = vector.load %arg3[%c0_9, %c0_10] : memref<10x2xf32, #tpu.memory_space<vmem>>, vector<10x2xf32>
    %cst_11 = arith.constant dense<0.000000e+00> : vector<2x2xf32>
    %32 = tpu.matmul %8, %31, %cst_11 {dimension_numbers = #tpu.dot_dimension_numbers<[1], [0], [0], [1], [0, 0, 1, 1], [], []>} : vector<2x10xf32>, vector<10x2xf32>, vector<2x2xf32> -> vector<2x2xf32>
    %c0_12 = arith.constant 0 : index
    %c0_13 = arith.constant 0 : index
    %33 = vector.load %arg4[%c0_12, %c0_13] : memref<1x2xf32, #tpu.memory_space<vmem>>, vector<1x2xf32>
    %34 = vector.broadcast %30 : vector<2x1xf32> to vector<2x2xf32>
    %35 = vector.broadcast %33 : vector<1x2xf32> to vector<2x2xf32>
    %36 = arith.mulf %34, %35 : vector<2x2xf32>
    %cst_14 = arith.constant 1.000000e+01 : f32
    %37 = vector.broadcast %cst_14 : f32 to vector<2x2xf32>
    %38 = arith.mulf %37, %36 : vector<2x2xf32>
    %cst_15 = arith.constant 9.99999997E-7 : f32
    %39 = vector.broadcast %cst_15 : f32 to vector<2x2xf32>
    %40 = arith.addf %38, %39 : vector<2x2xf32>
    %41 = arith.divf %32, %40 : vector<2x2xf32>
    %42 = vector.broadcast %23 : vector<2x1xf32> to vector<2x2xf32>
    %43 = arith.mulf %41, %42 : vector<2x2xf32>
    %cst_16 = arith.constant dense<0xFF800000> : vector<2xf32>
    %44 = vector.multi_reduction <maximumf>, %43, %cst_16 [1] : vector<2x2xf32> to vector<2xf32>
    %45 = vector.shape_cast %44 : vector<2xf32> to vector<2x1xf32>
    %46 = vector.broadcast %45 : vector<2x1xf32> to vector<2x2xf32>
    %47 = arith.subf %43, %46 : vector<2x2xf32>
    %48 = math.exp %47 : vector<2x2xf32>
    %cst_17 = arith.constant dense<0.000000e+00> : vector<2xf32>
    %49 = vector.multi_reduction <add>, %48, %cst_17 [1] : vector<2x2xf32> to vector<2xf32>
    %50 = vector.shape_cast %49 : vector<2xf32> to vector<2x1xf32>
    %51 = vector.broadcast %50 : vector<2x1xf32> to vector<2x2xf32>
    %52 = arith.divf %48, %51 : vector<2x2xf32>
    %cst_18 = arith.constant 0.000000e+00 : f32
    %53 = vector.broadcast %cst_18 : f32 to vector<2x16xf32>
    %54 = vector.extract_strided_slice %52 {offsets = [0, 0], sizes = [2, 1], strides = [1, 1]} : vector<2x2xf32> to vector<2x1xf32>
    %55 = vector.extract_strided_slice %24 {offsets = [0, 0], sizes = [2, 16], strides = [1, 1]} : vector<2x32xf32> to vector<2x16xf32>
    %56 = vector.broadcast %54 : vector<2x1xf32> to vector<2x16xf32>
    %57 = arith.mulf %56, %55 : vector<2x16xf32>
    %58 = arith.addf %53, %57 : vector<2x16xf32>
    %59 = vector.extract_strided_slice %52 {offsets = [0, 1], sizes = [2, 1], strides = [1, 1]} : vector<2x2xf32> to vector<2x1xf32>
    %60 = vector.extract_strided_slice %24 {offsets = [0, 16], sizes = [2, 16], strides = [1, 1]} : vector<2x32xf32> to vector<2x16xf32>
    %61 = vector.broadcast %59 : vector<2x1xf32> to vector<2x16xf32>
    %62 = arith.mulf %61, %60 : vector<2x16xf32>
    %63 = arith.addf %58, %62 : vector<2x16xf32>
    %c0_19 = arith.constant 0 : index
    %c0_20 = arith.constant 0 : index
    %64 = vector.load %arg5[%c0_19, %c0_20] : memref<2x16xf32, #tpu.memory_space<vmem>>, vector<2x16xf32>
    tpu.vector_store %arg5[%c0_19, %c0_20], %63 {strides = array<i32>} : memref<2x16xf32, #tpu.memory_space<vmem>>, vector<2x16xf32>,
    return
  }
}

</mosaic_0001>

<bundles_post_ra>
// kernel: programmed_controller_forward.1
= control target key start
LH: loop header
LB: loop body
LE: loop exit
PB: predicated region body
PF: predicated region fallthrough
CT: control target
= control target key end

     0   :  { %v369_v2 = vmov 0.0|0.0   ;;  %vm370_vm0 = vmmov 0   ;;  %v371_v4 = vmov 0.0   ;;  %s447_s0 = inlined_call_operand.vmem [shape: f32[2,16], index: 0, kind: input, shape index: {}]   ;;  %s448_s1 = inlined_call_operand.vmem [shape: f32[16,43], index: 1, kind: input, shape index: {}]   ;;  %s449_s2 = inlined_call_operand.vmem [shape: f32[1,11], index: 2, kind: input, shape index: {}]   ;;  %s450_s3 = inlined_call_operand.vmem [shape: f32[10,2], index: 3, kind: input, shape index: {}]   ;;  %s451_s4 = inlined_call_operand.vmem [shape: f32[1,2], index: 4, kind: input, shape index: {}]   ;;  %s452_s5 = inlined_call_operand.hbm [shape: f32[2,16], index: 5, kind: output, shape index: {}]  }
   0x1   :  { %v22_v0 = vld [vmem:[%s448_s1] sm:$0xff]  ;;  %v23_v1 = vld [vmem:[%s448_s1 + $0x8] sm:$0xff]  ;;  %310 = vmatprep.subr.bf16.mxu0 %v369_v2  ;;  %300 = vmatprep.mubr.msk.f32.mxu0 %vm370_vm0, %v371_v4 }
   0x2   :  { %v311_v3 = vpack.c.bf16 %v23_v1, %v22_v0 }
   0x3   :  { %10 = vsyncpa [#allocation3], 0  ;;  %313 = vmatprep.subr.bf16.mxu1 %v369_v2  ;;  %307 = vmatprep.mubr.msk.f32.mxu1 %vm370_vm0, %v371_v4  ;;  %v21_v5 = vld [vmem:[%s447_s0] sm:$0x3]  ;;  %vm24_vm1 = vcmask 130048   ;;  %vm144_vm2 = vcmask 1041408  }
   0x4   :  { %312 = vmatpush3.bf16.msra.mxu0 %v311_v3  ;;  %v138_v6 = vld [vmem:[%s450_s3] sm:$0xff]  ;;  %v139_v7 = vld [vmem:[%s450_s3 + $0x8] sm:$0x3]  ;;  %vm372_vm3 = vmmov 1   ;;  %v373_v9 = vmov 10   ;;  %vm140_vm5 = vcmask 80896  }
   0x5   :  { %v314_v8 = vpack.c.bf16 %v139_v7, %v138_v6  ;;  %vm315_vm4 = vmpackc.low %vm144_vm2, %vm372_vm3  ;;  %327 = vset.pattern.permute.xlu0 %v373_v9  ;;  %v286_v10 = vld [vmem:[%s449_s2] ss:$0 sm:$0xff]  ;;  %vm126_vm6 = vcmask 74752   ;;  %vm236_vm11 = vcmask 9216   ;;  %v374_v55 = vmov 1   ;;  %s376_s3 = smov 112  }
   0x6   :  { %v289_v39 = vld [vmem:[%s451_s4] ss:$0 sm:$0xff]  ;;  %328 = vset.pattern.permute.xlu1 %v374_v55  ;;  %v375_v59 = vmov 0   ;;  %s377_s4 = smov 117   ;;  %s378_s29 = smov [#allocation2]   ;;  %vm269_vm12 = vcmask 123904  }
   0x7   :  { %301 = vmatmul.mubr.msk.f32.vlgmr.msra.gmra.mrb[0].mxu0 %vm24_vm1, %v21_v5  ;;  %316 = vmatpush3.bf16.msk.msra.mxu1 %vm315_vm4, %v314_v8  ;;  %s277_s30 = sshll.u32 %s378_s29, 4  ;;  %s278_s30 = int_to_ptr.vmem [resolvable:$true] %s277_s30 }
   0x8   :  { %s345_s6 = scalar_lea.vmem %s278_s30, 32  ;;  %p350_p1 = scmp.lt.s32.totalorder %s278_s30, %s278_s30 }
   0x9   :  { %p346_p0 = scmp.ne.s32.totalorder %s278_s30, %s345_s6  ;;  %p351_p2 = scmp.lt.s32.totalorder %s345_s6, %s345_s6 }
   0xb   :  { %p352_p3 = por %p351_p2, %p350_p1 }
   0xd   :  { %p353_p4 = pnand %p352_p3, %p346_p0 }
  0xda   :  { %v427_v11 = vpop.f32.mrb[0].mxu0 }
  0xdb   :  { %v105_v12 = vadd.f32 %v286_v10, %v427_v11  ;;  %v302_v13 = vpop.f32.mrb[1].mxu0 }
  0xdd   :  { %331 = vtanh.f32 %v105_v12  ;;  %v110_v14 = vand.u32 2147483647, %v105_v12  ;;  %v107_v28 = vmax.f32 %v105_v12, 0.0  ;;  %vm108_vm8 = vcmp.ne.f32.partialorder %v105_v12, %v105_v12 }
  0xdf   :  { %v111_v15 = vsub.f32 0.0, %v110_v14 }
  0xe1   :  { %v112_v16 = vmul.f32 1.442695, %v111_v15 }
  0xe3   :  { %333 = vpow2.f32 %v112_v16 }
  0xe7   :  { %v332_v17 = vpop.eup %331 }
  0xe8   :  { %308 = vmatmul.mubr.msk.f32.vlgmr.msra.gmra.mrb[0].mxu1 %vm140_vm5, %v332_v17  ;;  %v125_v18 = vmul.f32 %v332_v17, %v332_v17 }
  0xea   :  { %v127_v19 = vsel %vm126_vm6, %v125_v18, 0.0 }
  0xeb   :  { %128 = vadd.xlane.f32.xlu0 %v127_v19 }
  0xed   :  { %v334_v20 = vpop.eup %333 }
  0xee   :  { %v114_v21 = vadd.f32 1.0, %v334_v20  ;;  %v117_v22 = vmul.f32 -0.5, %v334_v20  ;;  %v120_v24 = vand.u32 2147483647, %v334_v20 }
  0xf0   :  { %335 = vlog2.f32 %v114_v21  ;;  %v118_v23 = vadd.f32 1.0, %v117_v22  ;;  %vm121_vm7 = vcmp.lt.f32.partialorder %v120_v24, 0.0004427343 }
  0xf2   :  { %v119_v27 = vmul.f32 %v334_v20, %v118_v23 }
  0xfa   :  { %v336_v25 = vpop.eup %335 }
  0xfb   :  { %v116_v26 = vmul.f32 0.6931472, %v336_v25 }
  0xfd   :  { %v122_v29 = vsel %vm121_vm7, %v119_v27, %v116_v26 }
  0xfe   :  { %v123_v30 = vadd.f32 %v122_v29, %v107_v28 }
 0x100   :  { %v124_v31 = vsel %vm108_vm8, %v105_v12, %v123_v30 }
 0x101   :  { %232 = vperm.xlu0 %327, %v124_v31  }
 0x105   :  { %330 = vset.pattern.permute.xlu0 %v374_v55 }
 0x178   :  { %v129_v32 = vpop.xlane.xlu0 %128 }
 0x179   :  { %337 = vrsqrt.f32 %v129_v32  ;;  %vm132_vm9 = vcmp.eq.f32.partialorder %v129_v32, inf  ;;  %v135_v36 = vand.u32 2147483648, %v129_v32  ;;  %vm134_vm10 = vcmp.eq.f32.partialorder %v129_v32, 0.0 }
 0x180   :  { %v233_v47 = vpop.permute.xlu0 %232 }
 0x183   :  { %v338_v33 = vpop.eup %337 }
 0x184   :  { %v131_v34 = vmul.f32 %v338_v33, %v129_v32 }
 0x186   :  { %v133_v35 = vsel %vm132_vm9, %v129_v32, %v131_v34 }
 0x187   :  { %v136_v37 = vsel %vm134_vm10, %v135_v36, %v133_v35 }
 0x188   :  { %v137_v38 = vadd.f32 1e-06, %v136_v37 }
 0x18a   :  { %v225_v40 = vmul.f32 %v289_v39, %v137_v38 }
 0x18c   :  { %v226_v41 = vmul.f32 10.0, %v225_v40 }
 0x18e   :  { %v227_v42 = vadd.f32 1e-06, %v226_v41 }
 0x190   :  { %339 = vrcp.f32 %v227_v42 }
 0x19a   :  { %v340_v43 = vpop.eup %339 }
 0x1bb   :  { %v214_v44 = vpop.f32.mrb[0].mxu1 }
 0x1bc   :  { %v229_v45 = vmul.f32 %v340_v43, %v214_v44  ;;  %v309_v46 = vpop.f32.mrb[1].mxu1 }
 0x1be   :  { %v235_v48 = vmul.f32 %v233_v47, %v229_v45 }
 0x1c0   :  { %v237_v49 = vsel %vm236_vm11, %v235_v48, -inf }
 0x1c1   :  { %238 = vmax.xlane.f32.xlu1 %v237_v49 }
 0x24e   :  { %v239_v50 = vpop.xlane.xlu1 %238 }
 0x24f   :  { %v240_v51 = vsub.f32 %v235_v48, %v239_v50 }
 0x251   :  { %v241_v52 = vmul.f32 1.442695, %v240_v51 }
 0x253   :  { %341 = vpow2.f32 %v241_v52 }
 0x25d   :  { %v342_v53 = vpop.eup %341 }
 0x25e   :  { %v243_v54 = vsel %vm236_vm11, %v342_v53, 0.0 }
 0x25f   :  { %244 = vadd.xlane.f32.xlu1 %v243_v54 }
 0x2ec   :  { %v245_v56 = vpop.xlane.xlu1 %244 }
 0x2ed   :  { %343 = vrcp.f32 %v245_v56 }
 0x2f7   :  { %v344_v57 = vpop.eup %343 }
 0x2f8   :  { %v247_v58 = vmul.f32 %v344_v57, %v342_v53 }
 0x2fa   :  { %256 = vperm.xlu1 %328, %v247_v58  }
 0x2fe   :  { %329 = vset.pattern.permute.xlu1 %v375_v59 }
 0x2ff   :  { %250 = vperm.xlu1 %329, %v247_v58  }
 0x379   :  { %v257_v60 = vpop.permute.xlu1 %256 }
 0x37a   :  { %v259_v61 = vmul.f32 %v257_v60, %v427_v11 }
 0x37c   :  { %261 = vrot.lane.b32.xlu1 %v259_v61, %s376_s3 }
 0x37e   :  { %v251_v62 = vpop.permute.xlu1 %250 }
 0x37f   :  { %v253_v63 = vmul.f32 %v251_v62, %v427_v11 }
 0x3ee   :  { %v262_v0 = vpop.permute.xlu1 %261 }
 0x3ef   :  { %v264_v1 = vadd.f32 %v262_v0, %v253_v63 }
 0x3f1   :  { %266 = vrot.lane.b32.xlu1 %v264_v1, %s377_s4 }
 0x463   :  { %v267_v2 = vpop.permute.xlu1 %266 }
 0x464   :  { %270 = vst.msk [vmem:[#allocation2] sm:$0x3] %vm269_vm12, %v267_v2 }
 0x465   :  { %356 = shalt.err (!%p353_p4)
}
 0x466   :  { %s357_s9 = scalar_lea.hbm %s452_s5, 32 }
 0x467   :  { %p358_p5 = scmp.ne.s32.totalorder %s452_s5, %s357_s9  ;;  %p361_p6 = scmp.lt.u32.totalorder %s357_s9, %s452_s5 }
 0x469   :  { %p363_p7 = pnand %p361_p6, %p358_p5 }
 0x46b   :  { %366 = shalt.err (!%p363_p7)
}
 0x46c   :  { %280 = dma.vmem_to_hbm [thread:$0]  %s278_s30, 32, %s452_s5, [#allocation3]  }
 0x46d   :  { %367 = dma.done.wait [#allocation3], 32  }
 0x46e   :  { %368 = vsyncadd [#allocation3], 4294967264 }
 0x46f   :  { %284 = vsyncpa [#allocation3], 1 }

</bundles_post_ra>
